<compile_context>
chip_gen: v7x
topology: tpu7x:2x2x1
jax: 0.10.0
libtpu: 0.0.40
codegen_flags: <defaults>
</compile_context>

<pallas_src>
import math
import numpy as np
import jax
import jax.numpy as jnp
from jax.experimental import pallas as pl
from jax.experimental.pallas import tpu as pltpu


def _fused_cross_attn_kernel(x1_ref, x2_ref, w1_ref, w2_ref, b1_ref, b2_ref,
                             o1_ref, o2_ref):
    """Both directions in one step:

    o1 = x1 @ W1 + b1   (seq2graph: depends only on key/value input modal1)
    o2 = x2 @ W2 + b2   (graph2seq: depends only on key/value input modal2)

    x*_ref : [tb, D]   w*_ref : [D, D]   b*_ref : [1, D]   o*_ref : [tb, D]
    """
    o1_ref[...] = (
        jnp.dot(x1_ref[...], w1_ref[...], preferred_element_type=jnp.float32)
        + b1_ref[...]
    ).astype(o1_ref.dtype)
    o2_ref[...] = (
        jnp.dot(x2_ref[...], w2_ref[...], preferred_element_type=jnp.float32)
        + b2_ref[...]
    ).astype(o2_ref.dtype)


def _pick_batch_tile(B):
    # Tile the batch only when it is large and divides cleanly; otherwise one step
    # with the whole arrays resident in VMEM (typical for this module's shapes).
    for tb in (512, 256, 128):
        if B > tb and B % tb == 0:
            return tb
    return B


def cross_modal_attention_fused(modal1, modal2, w1, w2, b1, b2):
    """modal1/modal2: [B, D]; w*: [D, D]; b*: [1, D] -> (out1 [B, D], out2 [B, D])."""
    B, D = modal1.shape
    tb = _pick_batch_tile(B)

    x_spec = pl.BlockSpec((tb, D), lambda i: (i, 0))
    w_spec = pl.BlockSpec((D, D), lambda i: (0, 0))   # constant index -> stays in VMEM
    b_spec = pl.BlockSpec((1, D), lambda i: (0, 0))
    o_spec = pl.BlockSpec((tb, D), lambda i: (i, 0))

    return pl.pallas_call(
        _fused_cross_attn_kernel,
        out_shape=(
            jax.ShapeDtypeStruct((B, D), modal1.dtype),
            jax.ShapeDtypeStruct((B, D), modal2.dtype),
        ),
        grid=(B // tb,),
        in_specs=[x_spec, x_spec, w_spec, w_spec, b_spec, b_spec],
        out_specs=(o_spec, o_spec),
        compiler_params=pltpu.CompilerParams(
            dimension_semantics=("parallel",)),
    )(modal1, modal2, w1, w2, b1, b2)


class CrossModalAttentionPallas:
    """JAX/Pallas re-implementation of the PyTorch CrossModalAttention module (inference)."""

    def __init__(self, output_dim, num_heads, dropout, key):
        assert output_dim % num_heads == 0
        self.D = output_dim
        self.H = num_heads
        self.head_dim = output_dim // num_heads
        self.dropout = dropout  # inference: no-op

        D = output_dim
        keys = jax.random.split(key, 4)
        lim_in = 1.0 / math.sqrt(D)

        def make_mha_params(k_in, k_out):
            # PyTorch MHA: in_proj_weight [3D, D], in_proj_bias [3D] (zeros),
            #              out_proj.weight [D, D], out_proj.bias [D] (zeros).
            in_proj_w = jax.random.uniform(k_in, (3 * D, D), jnp.float32, -lim_in, lim_in)
            in_proj_b = jnp.zeros((3 * D,), jnp.float32)
            out_w = jax.random.uniform(k_out, (D, D), jnp.float32, -lim_in, lim_in)
            out_b = jnp.zeros((D,), jnp.float32)
            wq, wk, wv = in_proj_w[0:D], in_proj_w[D:2 * D], in_proj_w[2 * D:3 * D]
            bq, bk, bv = in_proj_b[0:D], in_proj_b[D:2 * D], in_proj_b[2 * D:3 * D]
            # Pre-transposed so y = x @ W^T becomes x @ wt.
            return dict(
                wqt=wq.T, wkt=wk.T, wvt=wv.T, wot=out_w.T,
                bq=bq.reshape(1, D), bk=bk.reshape(1, D), bv=bv.reshape(1, D),
                bo=out_b.reshape(1, D),
            )

        # Keep the raw (un-folded) params for the pure-JAX reference check.
        self.seq2graph = make_mha_params(keys[0], keys[1])
        self.graph2seq = make_mha_params(keys[2], keys[3])

        def fold(p):
            # (kv @ wvt + bv) @ wot + bo  ==  kv @ (wvt @ wot) + (bv @ wot + bo)
            w_fold = p["wvt"] @ p["wot"]                  # [D, D]
            b_fold = p["bv"] @ p["wot"] + p["bo"]         # [1, D]
            return w_fold, b_fold

        self.w_s2g, self.b_s2g = fold(self.seq2graph)
        self.w_g2s, self.b_g2s = fold(self.graph2seq)

    def __call__(self, modal1, modal2):
        # seq2graph(query=modal2, key=value=modal1): with seq_len==1 the output depends
        # only on the key/value input (modal1). Likewise graph2seq depends only on modal2.
        return cross_modal_attention_fused(
            modal1, modal2, self.w_s2g, self.w_g2s, self.b_s2g, self.b_g2s)

    # Pure-JAX reference: the FULL MultiheadAttention math (q/k/v projections, per-head
    # scaled dot-product, softmax over the length-1 key axis, output projection).
    def reference(self, modal1, modal2):
        def mha(xq, xkv, p):
            q = xq @ p["wqt"] + p["bq"]
            k = xkv @ p["wkt"] + p["bk"]
            v = xkv @ p["wvt"] + p["bv"]
            B, D = q.shape
            qh = q.reshape(B, self.H, self.head_dim)
            kh = k.reshape(B, self.H, self.head_dim)
            vh = v.reshape(B, self.H, self.head_dim)
            s = jnp.sum(qh * kh, -1, keepdims=True) / math.sqrt(self.head_dim)  # [B,H,1]
            w = jax.nn.softmax(s, axis=-1)                                      # == 1.0
            attn = (w * vh).reshape(B, D)
            return attn @ p["wot"] + p["bo"]
        return mha(modal2, modal1, self.seq2graph), mha(modal1, modal2, self.graph2seq)


if __name__ == "__main__":
    B, D, H = 8, 32, 4
    key = jax.random.PRNGKey(0)
    k_mod, k_x1, k_x2 = jax.random.split(key, 3)

    module = CrossModalAttentionPallas(output_dim=D, num_heads=H, dropout=0.1, key=k_mod)

    modal1 = jax.random.normal(k_x1, (B, D), jnp.float32)
    modal2 = jax.random.normal(k_x2, (B, D), jnp.float32)

    m1_w, m2_w = module(modal1, modal2)
    jax.block_until_ready((m1_w, m2_w))

    r1, r2 = module.reference(modal1, modal2)
    assert m1_w.shape == (B, D) and m2_w.shape == (B, D)
    assert np.allclose(np.asarray(m1_w), np.asarray(r1), atol=1e-4, rtol=1e-4)
    assert np.allclose(np.asarray(m2_w), np.asarray(r2), atol=1e-4, rtol=1e-4)

    print("KERNEL_OK")
</pallas_src>

<mosaic_0001>
module attributes {stable_mosaic.version = 11 : i64} {
  func.func @_fused_cross_attn_kernel(%arg0: i32, %arg1: memref<8x32xf32, #tpu.memory_space<vmem>>, %arg2: memref<8x32xf32, #tpu.memory_space<vmem>>, %arg3: memref<32x32xf32, #tpu.memory_space<vmem>>, %arg4: memref<32x32xf32, #tpu.memory_space<vmem>>, %arg5: memref<1x32xf32, #tpu.memory_space<vmem>>, %arg6: memref<1x32xf32, #tpu.memory_space<vmem>>, %arg7: memref<8x32xf32, #tpu.memory_space<vmem>>, %arg8: memref<8x32xf32, #tpu.memory_space<vmem>>) attributes {dimension_semantics = [#tpu.dimension_semantics<parallel>], iteration_bounds = array<i64: 1>, scalar_prefetch = 0 : i64, scratch_operands = 0 : i64, tpu.core_type = #tpu.core_type<tc>, window_params = [{transform_indices = @transform_0, window_bounds = array<i64: 8, 32>}, {transform_indices = @transform_1, window_bounds = array<i64: 8, 32>}, {pipeline_mode = #tpu.pipeline_mode<synchronous>, transform_indices = @transform_2, window_bounds = array<i64: 32, 32>}, {pipeline_mode = #tpu.pipeline_mode<synchronous>, transform_indices = @transform_3, window_bounds = array<i64: 32, 32>}, {pipeline_mode = #tpu.pipeline_mode<synchronous>, transform_indices = @transform_4, window_bounds = array<i64: 1, 32>}, {pipeline_mode = #tpu.pipeline_mode<synchronous>, transform_indices = @transform_5, window_bounds = array<i64: 1, 32>}, {transform_indices = @transform_6, window_bounds = array<i64: 8, 32>}, {transform_indices = @transform_7, window_bounds = array<i64: 8, 32>}]} {
    %c0 = arith.constant 0 : index
    %c0_0 = arith.constant 0 : index
    %0 = vector.load %arg1[%c0, %c0_0] : memref<8x32xf32, #tpu.memory_space<vmem>>, vector<8x32xf32>
    %c0_1 = arith.constant 0 : index
    %c0_2 = arith.constant 0 : index
    %1 = vector.load %arg3[%c0_1, %c0_2] : memref<32x32xf32, #tpu.memory_space<vmem>>, vector<32x32xf32>
    %cst = arith.constant dense<0.000000e+00> : vector<8x32xf32>
    %2 = tpu.matmul %0, %1, %cst {dimension_numbers = #tpu.dot_dimension_numbers<[1], [0], [0], [1], [0, 0, 1, 1], [], []>} : vector<8x32xf32>, vector<32x32xf32>, vector<8x32xf32> -> vector<8x32xf32>
    %c0_3 = arith.constant 0 : index
    %c0_4 = arith.constant 0 : index
    %3 = vector.load %arg5[%c0_3, %c0_4] : memref<1x32xf32, #tpu.memory_space<vmem>>, vector<1x32xf32>
    %4 = vector.broadcast %3 : vector<1x32xf32> to vector<8x32xf32>
    %5 = arith.addf %2, %4 : vector<8x32xf32>
    %c0_5 = arith.constant 0 : index
    %c0_6 = arith.constant 0 : index
    %6 = vector.load %arg7[%c0_5, %c0_6] : memref<8x32xf32, #tpu.memory_space<vmem>>, vector<8x32xf32>
    tpu.vector_store %arg7[%c0_5, %c0_6], %5 {strides = array<i32>} : memref<8x32xf32, #tpu.memory_space<vmem>>, vector<8x32xf32>,
    %c0_7 = arith.constant 0 : index
    %c0_8 = arith.constant 0 : index
    %7 = vector.load %arg2[%c0_7, %c0_8] : memref<8x32xf32, #tpu.memory_space<vmem>>, vector<8x32xf32>
    %c0_9 = arith.constant 0 : index
    %c0_10 = arith.constant 0 : index
    %8 = vector.load %arg4[%c0_9, %c0_10] : memref<32x32xf32, #tpu.memory_space<vmem>>, vector<32x32xf32>
    %cst_11 = arith.constant dense<0.000000e+00> : vector<8x32xf32>
    %9 = tpu.matmul %7, %8, %cst_11 {dimension_numbers = #tpu.dot_dimension_numbers<[1], [0], [0], [1], [0, 0, 1, 1], [], []>} : vector<8x32xf32>, vector<32x32xf32>, vector<8x32xf32> -> vector<8x32xf32>
    %c0_12 = arith.constant 0 : index
    %c0_13 = arith.constant 0 : index
    %10 = vector.load %arg6[%c0_12, %c0_13] : memref<1x32xf32, #tpu.memory_space<vmem>>, vector<1x32xf32>
    %11 = vector.broadcast %10 : vector<1x32xf32> to vector<8x32xf32>
    %12 = arith.addf %9, %11 : vector<8x32xf32>
    %c0_14 = arith.constant 0 : index
    %c0_15 = arith.constant 0 : index
    %13 = vector.load %arg8[%c0_14, %c0_15] : memref<8x32xf32, #tpu.memory_space<vmem>>, vector<8x32xf32>
    tpu.vector_store %arg8[%c0_14, %c0_15], %12 {strides = array<i32>} : memref<8x32xf32, #tpu.memory_space<vmem>>, vector<8x32xf32>,
    return
  }
  func.func @transform_0(%arg0: i32) -> (i32, i32) {
    %c0_i32 = arith.constant 0 : i32
    %c0_i32_0 = arith.constant 0 : i32
    return %arg0, %c0_i32 : i32, i32
  }
  func.func @transform_1(%arg0: i32) -> (i32, i32) {
    %c0_i32 = arith.constant 0 : i32
    %c0_i32_0 = arith.constant 0 : i32
    return %arg0, %c0_i32 : i32, i32
  }
  func.func @transform_2(%arg0: i32) -> (i32, i32) {
    %c0_i32 = arith.constant 0 : i32
    %c0_i32_0 = arith.constant 0 : i32
    %c0_i32_1 = arith.constant 0 : i32
    return %c0_i32, %c0_i32_0 : i32, i32
  }
  func.func @transform_3(%arg0: i32) -> (i32, i32) {
    %c0_i32 = arith.constant 0 : i32
    %c0_i32_0 = arith.constant 0 : i32
    %c0_i32_1 = arith.constant 0 : i32
    return %c0_i32, %c0_i32_0 : i32, i32
  }
  func.func @transform_4(%arg0: i32) -> (i32, i32) {
    %c0_i32 = arith.constant 0 : i32
    %c0_i32_0 = arith.constant 0 : i32
    %c0_i32_1 = arith.constant 0 : i32
    return %c0_i32, %c0_i32_0 : i32, i32
  }
  func.func @transform_5(%arg0: i32) -> (i32, i32) {
    %c0_i32 = arith.constant 0 : i32
    %c0_i32_0 = arith.constant 0 : i32
    %c0_i32_1 = arith.constant 0 : i32
    return %c0_i32, %c0_i32_0 : i32, i32
  }
  func.func @transform_6(%arg0: i32) -> (i32, i32) {
    %c0_i32 = arith.constant 0 : i32
    %c0_i32_0 = arith.constant 0 : i32
    return %arg0, %c0_i32 : i32, i32
  }
  func.func @transform_7(%arg0: i32) -> (i32, i32) {
    %c0_i32 = arith.constant 0 : i32
    %c0_i32_0 = arith.constant 0 : i32
    return %arg0, %c0_i32 : i32, i32
  }
}

</mosaic_0001>

<bundles_post_ra>
// kernel: tpu_custom_call.1
= control target key start
LH: loop header
LB: loop body
LE: loop exit
PB: predicated region body
PF: predicated region fallthrough
CT: control target
= control target key end

     0   :  { %13 = vsyncpa [#allocation3], 0  ;;  %s616_s0 = inlined_call_operand.hbm [shape: f32[8,32], index: 0, kind: input, shape index: {}]   ;;  %s617_s1 = inlined_call_operand.hbm [shape: f32[8,32], index: 1, kind: input, shape index: {}]   ;;  %s618_s2 = inlined_call_operand.hbm [shape: f32[32,32], index: 2, kind: input, shape index: {}]   ;;  %s619_s3 = inlined_call_operand.hbm [shape: f32[32,32], index: 3, kind: input, shape index: {}]   ;;  %s620_s4 = inlined_call_operand.vmem [shape: f32[1,32], index: 4, kind: input, shape index: {}]   ;;  %s621_s5 = inlined_call_operand.vmem [shape: f32[1,32], index: 5, kind: input, shape index: {}]   ;;  %s622_s6 = inlined_call_operand.hbm [shape: f32[8,32], index: 6, kind: output, shape index: {0}]   ;;  %s623_s7 = inlined_call_operand.hbm [shape: f32[8,32], index: 7, kind: output, shape index: {1}]  }
   0x1   :  { %14 = vsyncpa [#allocation6], 0 }
   0x2   :  { %15 = vsyncpa [#allocation9], 0 }
   0x3   :  { %16 = vsyncpa [#allocation4], 0 }
   0x4   :  { %17 = vsyncpa [#allocation12], 0  ;;  %s483_s24 = smov [#allocation5]   ;;  %s484_s26 = smov [#allocation2]  }
   0x5   :  { %s34_s25 = sshll.u32 %s483_s24, 4  ;;  %s24_s27 = sshll.u32 %s484_s26, 4  ;;  %s35_s25 = int_to_ptr.vmem [resolvable:$true] %s34_s25  ;;  %s25_s27 = int_to_ptr.vmem [resolvable:$true] %s24_s27 }
   0x6   :  { %s341_s30 = scalar_lea.hbm %s617_s1, 128 }
   0x7   :  { %p342_p0 = scmp.ne.s32.totalorder %s617_s1, %s341_s30  ;;  %p345_p1 = scmp.lt.u32.totalorder %s341_s30, %s617_s1 }
   0x9   :  { %p347_p2 = pnand %p345_p1, %p342_p0 }
   0xb   :  { %350 = shalt.err (!%p347_p2)
}
   0xc   :  { %s351_s12 = scalar_lea.vmem %s35_s25, 128  ;;  %p356_p4 = scmp.lt.s32.totalorder %s35_s25, %s35_s25 }
   0xd   :  { %p352_p3 = scmp.ne.s32.totalorder %s35_s25, %s351_s12  ;;  %p357_p5 = scmp.lt.s32.totalorder %s351_s12, %s351_s12 }
   0xf   :  { %p358_p6 = por %p357_p5, %p356_p4 }
  0x11   :  { %p359_p7 = pnand %p358_p6, %p352_p3 }
  0x13   :  { %362 = shalt.err (!%p359_p7)
}
  0x14   :  { %37 = dma.hbm_to_vmem [thread:$0]  %s617_s1, 128, %s35_s25, [#allocation6]  }
  0x15   :  { %s363_s17 = scalar_lea.hbm %s616_s0, 128 }
  0x16   :  { %p364_p8 = scmp.ne.s32.totalorder %s616_s0, %s363_s17  ;;  %p367_p9 = scmp.lt.u32.totalorder %s363_s17, %s616_s0 }
  0x18   :  { %p369_p10 = pnand %p367_p9, %p364_p8 }
  0x1a   :  { %372 = shalt.err (!%p369_p10)
}
  0x1b   :  { %s373_s22 = scalar_lea.vmem %s25_s27, 128  ;;  %p378_p12 = scmp.lt.s32.totalorder %s25_s27, %s25_s27 }
  0x1c   :  { %p374_p11 = scmp.ne.s32.totalorder %s25_s27, %s373_s22  ;;  %p379_p13 = scmp.lt.s32.totalorder %s373_s22, %s373_s22 }
  0x1e   :  { %p380_p0 = por %p379_p13, %p378_p12 }
  0x20   :  { %p381_p1 = pnand %p380_p0, %p374_p11 }
  0x22   :  { %384 = shalt.err (!%p381_p1)
}
  0x23   :  { %27 = dma.hbm_to_vmem [thread:$0]  %s616_s0, 128, %s25_s27, [#allocation3]  }
  0x24   :  { %s485_s24 = smov [#allocation7]   ;;  %s385_s29 = scalar_lea.hbm %s618_s2, 512 }
  0x25   :  { %s43_s25 = sshll.u32 %s485_s24, 4  ;;  %p386_p2 = scmp.ne.s32.totalorder %s618_s2, %s385_s29  ;;  %s44_s25 = int_to_ptr.vmem [resolvable:$true] %s43_s25 }
  0x26   :  { %p389_p3 = scmp.lt.u32.totalorder %s385_s29, %s618_s2 }
  0x28   :  { %p391_p4 = pnand %p389_p3, %p386_p2 }
  0x2a   :  { %394 = shalt.err (!%p391_p4)
}
  0x2b   :  { %s395_s11 = scalar_lea.vmem %s44_s25, 512  ;;  %p400_p6 = scmp.lt.s32.totalorder %s44_s25, %s44_s25 }
  0x2c   :  { %p396_p5 = scmp.ne.s32.totalorder %s44_s25, %s395_s11  ;;  %p401_p7 = scmp.lt.s32.totalorder %s395_s11, %s395_s11 }
  0x2e   :  { %p402_p8 = por %p401_p7, %p400_p6 }
  0x30   :  { %p403_p9 = pnand %p402_p8, %p396_p5 }
  0x32   :  { %406 = shalt.err (!%p403_p9)
}
  0x33   :  { %s486_s0 = smov 128   ;;  %s487_s27 = smov 8  }
  0x34   :  { %49 = dma.hbm_to_vmem [thread:$0]  %s618_s2, 512, %s44_s25, [#allocation6], %s486_s0, %s486_s0, %s487_s27  }
  0x35   :  { %s488_s14 = smov [#allocation8]   ;;  %s407_s18 = scalar_lea.hbm %s619_s3, 512 }
  0x36   :  { %s55_s15 = sshll.u32 %s488_s14, 4  ;;  %p408_p10 = scmp.ne.s32.totalorder %s619_s3, %s407_s18  ;;  %s56_s15 = int_to_ptr.vmem [resolvable:$true] %s55_s15 }
  0x37   :  { %p411_p11 = scmp.lt.u32.totalorder %s407_s18, %s619_s3 }
  0x39   :  { %p413_p12 = pnand %p411_p11, %p408_p10 }
  0x3b   :  { %416 = shalt.err (!%p413_p12)
}
  0x3c   :  { %s417_s1 = scalar_lea.vmem %s56_s15, 512  ;;  %p422_p0 = scmp.lt.s32.totalorder %s56_s15, %s56_s15 }
  0x3d   :  { %p418_p13 = scmp.ne.s32.totalorder %s56_s15, %s417_s1  ;;  %p423_p1 = scmp.lt.s32.totalorder %s417_s1, %s417_s1 }
  0x3f   :  { %p424_p2 = por %p423_p1, %p422_p0 }
  0x41   :  { %p425_p3 = pnand %p424_p2, %p418_p13 }
  0x43   :  { %428 = shalt.err (!%p425_p3)
}
  0x44   :  { %61 = dma.hbm_to_vmem [thread:$0]  %s619_s3, 512, %s56_s15, [#allocation9], %s486_s0, %s486_s0, %s487_s27  }
  0x45   :  { %473 = dma.done.wait [#allocation3], 128  }
  0x46   :  { %474 = vsyncadd [#allocation3], 4294967168 }
  0x47   :  { %475 = dma.done.wait [#allocation6], 640  }
  0x48   :  { %476 = vsyncadd [#allocation6], 4294966656 }
  0x49   :  { %477 = dma.done.wait [#allocation9], 512  }
  0x4a   :  { %478 = vsyncadd [#allocation9], 4294966784  ;;  %v489_v0 = vmov 0.0|0.0   ;;  %vm490_vm0 = vmmov 0   ;;  %v491_v1 = vmov 0.0   ;;  %v79_v2 = vld [vmem:[#allocation7] sm:$0xff] }
  0x4b   :  { %318 = vmatprep.subr.bf16.mxu0 %v489_v0  ;;  %324 = vmatprep.subr.bf16.mxu1 %v489_v0  ;;  %v80_v3 = vld [vmem:[#allocation7 + $0x8] sm:$0xff]  ;;  %v166_v4 = vld [vmem:[#allocation8] sm:$0xff]  ;;  %v81_v7 = vld [vmem:[#allocation7 + $0x10] sm:$0xff]  ;;  %vm90_vm1 = vcmask 261120   ;;  %s492_s25 = smov [#allocation10]   ;;  %s493_s30 = smov [#allocation11]  }
  0x4c   :  { %304 = vmatprep.mubr.msk.f32.mxu0 %vm490_vm0, %v491_v1  ;;  %315 = vmatprep.mubr.msk.f32.mxu1 %vm490_vm0, %v491_v1  ;;  %v319_v5 = vpack.c.bf16 %v80_v3, %v79_v2  ;;  %v167_v6 = vld [vmem:[#allocation8 + $0x8] sm:$0xff]  ;;  %v82_v8 = vld [vmem:[#allocation7 + $0x18] sm:$0xff]  ;;  %v168_v10 = vld [vmem:[#allocation8 + $0x10] sm:$0xff]  ;;  %s257_s26 = sshll.u32 %s492_s25, 4  ;;  %s267_s8 = sshll.u32 %s493_s30, 4  ;;  %s258_s26 = int_to_ptr.vmem [resolvable:$true] %s257_s26  ;;  %s268_s8 = int_to_ptr.vmem [resolvable:$true] %s267_s8 }
  0x4d   :  { %v325_v9 = vpack.c.bf16 %v167_v6, %v166_v4  ;;  %v169_v11 = vld [vmem:[#allocation8 + $0x18] sm:$0xff]  ;;  %v322_v12 = vpack.c.bf16 %v82_v8, %v81_v7  ;;  %v78_v14 = vld [vmem:[#allocation2] sm:$0xff]  ;;  %p434_p5 = scmp.lt.s32.totalorder %s258_s26, %s258_s26 }
  0x4e   :  { %320 = vmatpush3.bf16.msra.mxu0 %v319_v5  ;;  %v328_v13 = vpack.c.bf16 %v169_v11, %v168_v10  ;;  %v165_v15 = vld [vmem:[#allocation5] sm:$0xff]  ;;  %v282_v16 = vld [vmem:[%s620_s4] ss:$0 sm:$0xff]  ;;  %s429_s4 = scalar_lea.vmem %s258_s26, 128 }
  0x4f   :  { %326 = vmatpush3.bf16.msra.mxu1 %v325_v9  ;;  %321 = vmatprep.subr.bf16.mxu0 %v489_v0  ;;  %v284_v17 = vld [vmem:[%s621_s5] ss:$0 sm:$0xff]  ;;  %p430_p4 = scmp.ne.s32.totalorder %s258_s26, %s429_s4  ;;  %p435_p6 = scmp.lt.s32.totalorder %s429_s4, %s429_s4 }
  0x50   :  { %327 = vmatprep.subr.bf16.mxu1 %v489_v0 }
  0x51   :  { %p436_p7 = por %p435_p6, %p434_p5 }
  0x52   :  { %323 = vmatpush3.bf16.msra.mxu0 %v322_v12 }
  0x53   :  { %329 = vmatpush3.bf16.msra.mxu1 %v328_v13  ;;  %p437_p8 = pnand %p436_p7, %p430_p4 }
  0x55   :  { %305 = vmatmul.mubr.msk.f32.vlgmr.msra.gmra.mrb[0].mxu0 %vm90_vm1, %v78_v14 }
  0x56   :  { %316 = vmatmul.mubr.msk.f32.vlgmr.msra.gmra.mrb[0].mxu1 %vm90_vm1, %v165_v15 }
 0x128   :  { %v160_v18 = vpop.f32.mrb[0].mxu0 }
 0x129   :  { %v161_v19 = vadd.f32 %v282_v16, %v160_v18  ;;  %v246_v20 = vpop.f32.mrb[0].mxu1  ;;  %v306_v21 = vpop.f32.mrb[1].mxu0 }
 0x12a   :  { %v247_v22 = vadd.f32 %v284_v17, %v246_v20  ;;  %v317_v23 = vpop.f32.mrb[1].mxu1 }
 0x12b   :  { %164 = vst.msk [vmem:[#allocation10] sm:$0xff] %vm90_vm1, %v161_v19 }
 0x12c   :  { %250 = vst.msk [vmem:[#allocation11] sm:$0xff] %vm90_vm1, %v247_v22 }
 0x12d   :  { %440 = shalt.err (!%p437_p8)
}
 0x12e   :  { %s441_s10 = scalar_lea.hbm %s622_s6, 128 }
 0x12f   :  { %p442_p9 = scmp.ne.s32.totalorder %s622_s6, %s441_s10  ;;  %p445_p10 = scmp.lt.u32.totalorder %s441_s10, %s622_s6 }
 0x131   :  { %p447_p11 = pnand %p445_p10, %p442_p9 }
 0x133   :  { %450 = shalt.err (!%p447_p11)
}
 0x134   :  { %260 = dma.vmem_to_hbm [thread:$0]  %s258_s26, 128, %s622_s6, [#allocation4]  }
 0x135   :  { %s451_s15 = scalar_lea.vmem %s268_s8, 128  ;;  %p456_p13 = scmp.lt.s32.totalorder %s268_s8, %s268_s8 }
 0x136   :  { %p452_p12 = scmp.ne.s32.totalorder %s268_s8, %s451_s15  ;;  %p457_p0 = scmp.lt.s32.totalorder %s451_s15, %s451_s15 }
 0x138   :  { %p458_p1 = por %p457_p0, %p456_p13 }
 0x13a   :  { %p459_p2 = pnand %p458_p1, %p452_p12 }
 0x13c   :  { %462 = shalt.err (!%p459_p2)
}
 0x13d   :  { %s463_s18 = scalar_lea.hbm %s623_s7, 128 }
 0x13e   :  { %p464_p3 = scmp.ne.s32.totalorder %s623_s7, %s463_s18  ;;  %p467_p4 = scmp.lt.u32.totalorder %s463_s18, %s623_s7 }
 0x140   :  { %p469_p5 = pnand %p467_p4, %p464_p3 }
 0x142   :  { %472 = shalt.err (!%p469_p5)
}
 0x143   :  { %270 = dma.vmem_to_hbm [thread:$0]  %s268_s8, 128, %s623_s7, [#allocation12]  }
 0x144   :  { %479 = dma.done.wait [#allocation4], 128  }
 0x145   :  { %480 = vsyncadd [#allocation4], 4294967168 }
 0x146   :  { %481 = dma.done.wait [#allocation12], 128  }
 0x147   :  { %482 = vsyncadd [#allocation12], 4294967168 }
 0x148   :  { %277 = vsyncpa [#allocation3], 1 }
 0x149   :  { %278 = vsyncpa [#allocation6], 1 }
 0x14a   :  { %279 = vsyncpa [#allocation9], 1 }
 0x14b   :  { %280 = vsyncpa [#allocation4], 1 }
 0x14c   :  { %281 = vsyncpa [#allocation12], 1 }

</bundles_post_ra>
